<compile_context>
chip_gen: v7x
topology: tpu7x:2x2x1
jax: 0.10.0
libtpu: 0.0.40
codegen_flags: <defaults>
</compile_context>

<pallas_src>
import jax
import jax.numpy as jnp
from jax import lax
from jax.experimental import pallas as pl
from jax.experimental.pallas import tpu as pltpu


# PyTorch stacks LSTM gates as [i, f, g, o]; the kernel packs them as
# [i, f, o, g] so sigmoid is applied to one contiguous 3H-lane slice and tanh
# to the trailing H-lane slice.
_GATE_ORDER = (0, 1, 3, 2)


def _lstm_model_kernel(
    x_ref,                        # (N, I)
    wih1_ref, b1_ref,             # (I, 4H), (1, 4H)   lstm1 (h0=c0=0 -> whh1 unused)
    wih2_ref, whh2_ref, b2_ref,   # (H, 4H), (H, 4H), (1, 4H)
    wfc_ref, bfc_ref,             # (H, O), (1, O)     fc2(fc1(.)) folded
    out_ref,                      # (N, O)
):
    N = x_ref.shape[0]
    H = wih1_ref.shape[1] // 4
    sig = jax.nn.sigmoid

    x = x_ref[...]

    # ---- LSTM1: seq_len = 1, zero initial state -> c = i*g, h = o*tanh(c) ----
    # One lane-dense (N, 4H) matmul for all gates.
    g1 = jnp.dot(x, wih1_ref[...], preferred_element_type=jnp.float32) + b1_ref[...]
    s1 = sig(g1[:, : 3 * H])              # [i | f | o]  (f unused since c0 == 0)
    t1 = jnp.tanh(g1[:, 3 * H:])          # g
    c1 = s1[:, :H] * t1
    h1 = s1[:, 2 * H: 3 * H] * jnp.tanh(c1)           # (N, H)

    # ---- LSTM2: unbatched length-N recurrence over the rows of h1 ----------
    # The input projection is recurrence-independent -> hoist it out of the
    # serial loop as one (N, 4H) matmul (biases folded in here once).
    xg = jnp.dot(h1, wih2_ref[...], preferred_element_type=jnp.float32) + b2_ref[...]
    whh2 = whh2_ref[...]                               # (H, 4H), kept in vregs

    h = jnp.zeros((1, H), jnp.float32)
    c = jnp.zeros((1, H), jnp.float32)
    rows = []
    # N is small and static: fully unrolled loop, all slices static, h/c and
    # the output rows stay in registers (no VMEM carry traffic).
    for t in range(N):
        gates = xg[t:t + 1, :] + jnp.dot(
            h, whh2, preferred_element_type=jnp.float32)        # (1, 4H)
        s = sig(gates[:, : 3 * H])                              # [i | f | o]
        g = jnp.tanh(gates[:, 3 * H:])                          # g
        c = s[:, H:2 * H] * c + s[:, :H] * g
        h = s[:, 2 * H:3 * H] * jnp.tanh(c)
        rows.append(h)
    h2 = jnp.concatenate(rows, axis=0)                          # (N, H)

    # ---- FC head: fc1 and fc2 folded into one linear (no activation between) ----
    out = jnp.dot(h2, wfc_ref[...], preferred_element_type=jnp.float32) + bfc_ref[...]
    out_ref[...] = out.astype(out_ref.dtype)


def lstm_model_forward(x, kp):
    N = x.shape[0]
    O = kp["wfc"].shape[1]
    vmem = pl.BlockSpec(memory_space=pltpu.MemorySpace.VMEM)
    fn = pl.pallas_call(
        _lstm_model_kernel,
        out_shape=jax.ShapeDtypeStruct((N, O), jnp.float32),
        in_specs=[vmem] * 8,
        out_specs=vmem,
    )
    return fn(x,
              kp["wih1"], kp["b1"],
              kp["wih2"], kp["whh2"], kp["b2"],
              kp["wfc"], kp["bfc"])


def init_native_params(key, input_size, hidden_size, output_size):
    """Deterministic PyTorch-style params (native layouts, gate order i,f,g,o)."""
    H, I, O = hidden_size, input_size, output_size
    ks = jax.random.split(key, 12)
    bound = 1.0 / jnp.sqrt(jnp.float32(H))

    def u(k, shape):
        return jax.random.uniform(k, shape, jnp.float32, -bound, bound)

    return {
        "w_ih1": u(ks[0], (4 * H, I)), "w_hh1": u(ks[1], (4 * H, H)),
        "b_ih1": u(ks[2], (4 * H,)),   "b_hh1": u(ks[3], (4 * H,)),
        "w_ih2": u(ks[4], (4 * H, H)), "w_hh2": u(ks[5], (4 * H, H)),
        "b_ih2": u(ks[6], (4 * H,)),   "b_hh2": u(ks[7], (4 * H,)),
        "w_fc1": u(ks[8], (H, H)),     "b_fc1": u(ks[9], (H,)),
        "w_fc2": u(ks[10], (O, H)),    "b_fc2": u(ks[11], (O,)),
    }


def pack_params(native, hidden_size):
    """Repack PyTorch-native params into the lane-dense kernel layout."""
    H = hidden_size

    def pack_w(w):  # (4H, in) -> (in, 4H): gates reordered [i,f,o,g] and packed on lanes
        chunks = [w[g * H:(g + 1) * H] for g in _GATE_ORDER]    # each (H, in)
        return jnp.concatenate([c.T for c in chunks], axis=1)

    def pack_b(b_ih, b_hh):  # combined bias, reordered, (1, 4H)
        b = b_ih + b_hh
        chunks = [b[g * H:(g + 1) * H] for g in _GATE_ORDER]
        return jnp.concatenate(chunks).reshape(1, 4 * H)

    # fc2(fc1(y)) = y @ (W1.T @ W2.T) + (b1 @ W2.T + b2)   (no activation between)
    w_fold = native["w_fc1"].T @ native["w_fc2"].T              # (H, O)
    b_fold = native["b_fc1"] @ native["w_fc2"].T + native["b_fc2"]

    return {
        "wih1": pack_w(native["w_ih1"]),                        # (I, 4H)
        "b1":   pack_b(native["b_ih1"], native["b_hh1"]),       # (1, 4H)  (whh1 unused: h0=0)
        "wih2": pack_w(native["w_ih2"]),                        # (H, 4H)
        "whh2": pack_w(native["w_hh2"]),                        # (H, 4H)
        "b2":   pack_b(native["b_ih2"], native["b_hh2"]),       # (1, 4H)
        "wfc":  w_fold,                                         # (H, O)
        "bfc":  b_fold.reshape(1, -1),                          # (1, O)
    }


def reference_forward(x, native, hidden_size):
    """Pure-JAX replica of the PyTorch forward, using native (un-fused) params."""
    H = hidden_size
    sig = jax.nn.sigmoid

    def lstm_cell(x_t, h, c, w_ih, w_hh, b_ih, b_hh):
        gates = x_t @ w_ih.T + h @ w_hh.T + b_ih + b_hh
        i, f, g, o = jnp.split(gates, 4, axis=-1)
        c_new = sig(f) * c + sig(i) * jnp.tanh(g)
        h_new = sig(o) * jnp.tanh(c_new)
        return h_new, c_new

    N = x.shape[0]
    # lstm1: batch of N length-1 sequences, zero initial state
    h1, _ = lstm_cell(x, jnp.zeros((N, H)), jnp.zeros((N, H)),
                      native["w_ih1"], native["w_hh1"],
                      native["b_ih1"], native["b_hh1"])

    # lstm2: one unbatched sequence of length N (recurrence across the batch axis)
    def step(carry, x_t):
        h, c = carry
        h_new, c_new = lstm_cell(x_t, h, c,
                                 native["w_ih2"], native["w_hh2"],
                                 native["b_ih2"], native["b_hh2"])
        return (h_new, c_new), h_new

    (_, _), h2 = lax.scan(step, (jnp.zeros(H), jnp.zeros(H)), h1)

    fc1 = h2 @ native["w_fc1"].T + native["b_fc1"]
    return fc1 @ native["w_fc2"].T + native["b_fc2"]


if __name__ == "__main__":
    batch, input_size, hidden_size, output_size = 8, 16, 32, 4

    key = jax.random.PRNGKey(0)
    k_x, k_p = jax.random.split(key)
    x = jax.random.normal(k_x, (batch, input_size), dtype=jnp.float32)

    native = init_native_params(k_p, input_size, hidden_size, output_size)
    kp = pack_params(native, hidden_size)

    out = jax.block_until_ready(lstm_model_forward(x, kp))
    ref = jax.block_until_ready(reference_forward(x, native, hidden_size))

    assert out.shape == (batch, output_size)
    max_err = float(jnp.max(jnp.abs(out - ref)))
    assert max_err < 1e-3, f"mismatch vs pure-JAX reference: {max_err}"

    print("KERNEL_OK")
</pallas_src>

<mosaic_0001>
module attributes {stable_mosaic.version = 11 : i64} {
  func.func @_lstm_model_kernel(%arg0: memref<8x16xf32, #tpu.memory_space<vmem>>, %arg1: memref<16x128xf32, #tpu.memory_space<vmem>>, %arg2: memref<1x128xf32, #tpu.memory_space<vmem>>, %arg3: memref<32x128xf32, #tpu.memory_space<vmem>>, %arg4: memref<32x128xf32, #tpu.memory_space<vmem>>, %arg5: memref<1x128xf32, #tpu.memory_space<vmem>>, %arg6: memref<32x4xf32, #tpu.memory_space<vmem>>, %arg7: memref<1x4xf32, #tpu.memory_space<vmem>>, %arg8: memref<8x4xf32, #tpu.memory_space<vmem>>) attributes {dimension_semantics = [], scalar_prefetch = 0 : i64, scratch_operands = 0 : i64, tpu.core_type = #tpu.core_type<tc>} {
    %c0 = arith.constant 0 : index
    %c0_0 = arith.constant 0 : index
    %0 = vector.load %arg0[%c0, %c0_0] : memref<8x16xf32, #tpu.memory_space<vmem>>, vector<8x16xf32>
    %c0_1 = arith.constant 0 : index
    %c0_2 = arith.constant 0 : index
    %1 = vector.load %arg1[%c0_1, %c0_2] : memref<16x128xf32, #tpu.memory_space<vmem>>, vector<16x128xf32>
    %cst = arith.constant dense<0.000000e+00> : vector<8x128xf32>
    %2 = tpu.matmul %0, %1, %cst {dimension_numbers = #tpu.dot_dimension_numbers<[1], [0], [0], [1], [0, 0, 1, 1], [], []>} : vector<8x16xf32>, vector<16x128xf32>, vector<8x128xf32> -> vector<8x128xf32>
    %c0_3 = arith.constant 0 : index
    %c0_4 = arith.constant 0 : index
    %3 = vector.load %arg2[%c0_3, %c0_4] : memref<1x128xf32, #tpu.memory_space<vmem>>, vector<1x128xf32>
    %4 = vector.broadcast %3 : vector<1x128xf32> to vector<8x128xf32>
    %5 = arith.addf %2, %4 : vector<8x128xf32>
    %6 = vector.extract_strided_slice %5 {offsets = [0, 0], sizes = [8, 96], strides = [1, 1]} : vector<8x128xf32> to vector<8x96xf32>
    %7 = arith.negf %6 : vector<8x96xf32>
    %8 = math.exp %7 : vector<8x96xf32>
    %cst_5 = arith.constant 1.000000e+00 : f32
    %9 = vector.broadcast %cst_5 : f32 to vector<8x96xf32>
    %10 = arith.addf %9, %8 : vector<8x96xf32>
    %11 = arith.divf %9, %10 : vector<8x96xf32>
    %12 = vector.extract_strided_slice %5 {offsets = [0, 96], sizes = [8, 32], strides = [1, 1]} : vector<8x128xf32> to vector<8x32xf32>
    %13 = math.tanh %12 : vector<8x32xf32>
    %14 = vector.extract_strided_slice %11 {offsets = [0, 0], sizes = [8, 32], strides = [1, 1]} : vector<8x96xf32> to vector<8x32xf32>
    %15 = arith.mulf %14, %13 : vector<8x32xf32>
    %16 = vector.extract_strided_slice %11 {offsets = [0, 64], sizes = [8, 32], strides = [1, 1]} : vector<8x96xf32> to vector<8x32xf32>
    %17 = math.tanh %15 : vector<8x32xf32>
    %18 = arith.mulf %16, %17 : vector<8x32xf32>
    %c0_6 = arith.constant 0 : index
    %c0_7 = arith.constant 0 : index
    %19 = vector.load %arg3[%c0_6, %c0_7] : memref<32x128xf32, #tpu.memory_space<vmem>>, vector<32x128xf32>
    %cst_8 = arith.constant dense<0.000000e+00> : vector<8x128xf32>
    %20 = tpu.matmul %18, %19, %cst_8 {dimension_numbers = #tpu.dot_dimension_numbers<[1], [0], [0], [1], [0, 0, 1, 1], [], []>} : vector<8x32xf32>, vector<32x128xf32>, vector<8x128xf32> -> vector<8x128xf32>
    %c0_9 = arith.constant 0 : index
    %c0_10 = arith.constant 0 : index
    %21 = vector.load %arg5[%c0_9, %c0_10] : memref<1x128xf32, #tpu.memory_space<vmem>>, vector<1x128xf32>
    %22 = vector.broadcast %21 : vector<1x128xf32> to vector<8x128xf32>
    %23 = arith.addf %20, %22 : vector<8x128xf32>
    %c0_11 = arith.constant 0 : index
    %c0_12 = arith.constant 0 : index
    %24 = vector.load %arg4[%c0_11, %c0_12] : memref<32x128xf32, #tpu.memory_space<vmem>>, vector<32x128xf32>
    %cst_13 = arith.constant 0.000000e+00 : f32
    %25 = vector.broadcast %cst_13 : f32 to vector<1x32xf32>
    %cst_14 = arith.constant 0.000000e+00 : f32
    %26 = vector.broadcast %cst_14 : f32 to vector<1x32xf32>
    %27 = vector.extract_strided_slice %23 {offsets = [0, 0], sizes = [1, 128], strides = [1, 1]} : vector<8x128xf32> to vector<1x128xf32>
    %cst_15 = arith.constant dense<0.000000e+00> : vector<1x128xf32>
    %28 = tpu.matmul %25, %24, %cst_15 {dimension_numbers = #tpu.dot_dimension_numbers<[1], [0], [0], [1], [0, 0, 1, 1], [], []>} : vector<1x32xf32>, vector<32x128xf32>, vector<1x128xf32> -> vector<1x128xf32>
    %29 = arith.addf %27, %28 : vector<1x128xf32>
    %30 = vector.extract_strided_slice %29 {offsets = [0, 0], sizes = [1, 96], strides = [1, 1]} : vector<1x128xf32> to vector<1x96xf32>
    %31 = arith.negf %30 : vector<1x96xf32>
    %32 = math.exp %31 : vector<1x96xf32>
    %cst_16 = arith.constant 1.000000e+00 : f32
    %33 = vector.broadcast %cst_16 : f32 to vector<1x96xf32>
    %34 = arith.addf %33, %32 : vector<1x96xf32>
    %35 = arith.divf %33, %34 : vector<1x96xf32>
    %36 = vector.extract_strided_slice %29 {offsets = [0, 96], sizes = [1, 32], strides = [1, 1]} : vector<1x128xf32> to vector<1x32xf32>
    %37 = math.tanh %36 : vector<1x32xf32>
    %38 = vector.extract_strided_slice %35 {offsets = [0, 32], sizes = [1, 32], strides = [1, 1]} : vector<1x96xf32> to vector<1x32xf32>
    %39 = arith.mulf %38, %26 : vector<1x32xf32>
    %40 = vector.extract_strided_slice %35 {offsets = [0, 0], sizes = [1, 32], strides = [1, 1]} : vector<1x96xf32> to vector<1x32xf32>
    %41 = arith.mulf %40, %37 : vector<1x32xf32>
    %42 = arith.addf %39, %41 : vector<1x32xf32>
    %43 = vector.extract_strided_slice %35 {offsets = [0, 64], sizes = [1, 32], strides = [1, 1]} : vector<1x96xf32> to vector<1x32xf32>
    %44 = math.tanh %42 : vector<1x32xf32>
    %45 = arith.mulf %43, %44 : vector<1x32xf32>
    %46 = vector.extract_strided_slice %23 {offsets = [1, 0], sizes = [1, 128], strides = [1, 1]} : vector<8x128xf32> to vector<1x128xf32>
    %cst_17 = arith.constant dense<0.000000e+00> : vector<1x128xf32>
    %47 = tpu.matmul %45, %24, %cst_17 {dimension_numbers = #tpu.dot_dimension_numbers<[1], [0], [0], [1], [0, 0, 1, 1], [], []>} : vector<1x32xf32>, vector<32x128xf32>, vector<1x128xf32> -> vector<1x128xf32>
    %48 = arith.addf %46, %47 : vector<1x128xf32>
    %49 = vector.extract_strided_slice %48 {offsets = [0, 0], sizes = [1, 96], strides = [1, 1]} : vector<1x128xf32> to vector<1x96xf32>
    %50 = arith.negf %49 : vector<1x96xf32>
    %51 = math.exp %50 : vector<1x96xf32>
    %cst_18 = arith.constant 1.000000e+00 : f32
    %52 = vector.broadcast %cst_18 : f32 to vector<1x96xf32>
    %53 = arith.addf %52, %51 : vector<1x96xf32>
    %54 = arith.divf %52, %53 : vector<1x96xf32>
    %55 = vector.extract_strided_slice %48 {offsets = [0, 96], sizes = [1, 32], strides = [1, 1]} : vector<1x128xf32> to vector<1x32xf32>
    %56 = math.tanh %55 : vector<1x32xf32>
    %57 = vector.extract_strided_slice %54 {offsets = [0, 32], sizes = [1, 32], strides = [1, 1]} : vector<1x96xf32> to vector<1x32xf32>
    %58 = arith.mulf %57, %42 : vector<1x32xf32>
    %59 = vector.extract_strided_slice %54 {offsets = [0, 0], sizes = [1, 32], strides = [1, 1]} : vector<1x96xf32> to vector<1x32xf32>
    %60 = arith.mulf %59, %56 : vector<1x32xf32>
    %61 = arith.addf %58, %60 : vector<1x32xf32>
    %62 = vector.extract_strided_slice %54 {offsets = [0, 64], sizes = [1, 32], strides = [1, 1]} : vector<1x96xf32> to vector<1x32xf32>
    %63 = math.tanh %61 : vector<1x32xf32>
    %64 = arith.mulf %62, %63 : vector<1x32xf32>
    %65 = vector.extract_strided_slice %23 {offsets = [2, 0], sizes = [1, 128], strides = [1, 1]} : vector<8x128xf32> to vector<1x128xf32>
    %cst_19 = arith.constant dense<0.000000e+00> : vector<1x128xf32>
    %66 = tpu.matmul %64, %24, %cst_19 {dimension_numbers = #tpu.dot_dimension_numbers<[1], [0], [0], [1], [0, 0, 1, 1], [], []>} : vector<1x32xf32>, vector<32x128xf32>, vector<1x128xf32> -> vector<1x128xf32>
    %67 = arith.addf %65, %66 : vector<1x128xf32>
    %68 = vector.extract_strided_slice %67 {offsets = [0, 0], sizes = [1, 96], strides = [1, 1]} : vector<1x128xf32> to vector<1x96xf32>
    %69 = arith.negf %68 : vector<1x96xf32>
    %70 = math.exp %69 : vector<1x96xf32>
    %cst_20 = arith.constant 1.000000e+00 : f32
    %71 = vector.broadcast %cst_20 : f32 to vector<1x96xf32>
    %72 = arith.addf %71, %70 : vector<1x96xf32>
    %73 = arith.divf %71, %72 : vector<1x96xf32>
    %74 = vector.extract_strided_slice %67 {offsets = [0, 96], sizes = [1, 32], strides = [1, 1]} : vector<1x128xf32> to vector<1x32xf32>
    %75 = math.tanh %74 : vector<1x32xf32>
    %76 = vector.extract_strided_slice %73 {offsets = [0, 32], sizes = [1, 32], strides = [1, 1]} : vector<1x96xf32> to vector<1x32xf32>
    %77 = arith.mulf %76, %61 : vector<1x32xf32>
    %78 = vector.extract_strided_slice %73 {offsets = [0, 0], sizes = [1, 32], strides = [1, 1]} : vector<1x96xf32> to vector<1x32xf32>
    %79 = arith.mulf %78, %75 : vector<1x32xf32>
    %80 = arith.addf %77, %79 : vector<1x32xf32>
    %81 = vector.extract_strided_slice %73 {offsets = [0, 64], sizes = [1, 32], strides = [1, 1]} : vector<1x96xf32> to vector<1x32xf32>
    %82 = math.tanh %80 : vector<1x32xf32>
    %83 = arith.mulf %81, %82 : vector<1x32xf32>
    %84 = vector.extract_strided_slice %23 {offsets = [3, 0], sizes = [1, 128], strides = [1, 1]} : vector<8x128xf32> to vector<1x128xf32>
    %cst_21 = arith.constant dense<0.000000e+00> : vector<1x128xf32>
    %85 = tpu.matmul %83, %24, %cst_21 {dimension_numbers = #tpu.dot_dimension_numbers<[1], [0], [0], [1], [0, 0, 1, 1], [], []>} : vector<1x32xf32>, vector<32x128xf32>, vector<1x128xf32> -> vector<1x128xf32>
    %86 = arith.addf %84, %85 : vector<1x128xf32>
    %87 = vector.extract_strided_slice %86 {offsets = [0, 0], sizes = [1, 96], strides = [1, 1]} : vector<1x128xf32> to vector<1x96xf32>
    %88 = arith.negf %87 : vector<1x96xf32>
    %89 = math.exp %88 : vector<1x96xf32>
    %cst_22 = arith.constant 1.000000e+00 : f32
    %90 = vector.broadcast %cst_22 : f32 to vector<1x96xf32>
    %91 = arith.addf %90, %89 : vector<1x96xf32>
    %92 = arith.divf %90, %91 : vector<1x96xf32>
    %93 = vector.extract_strided_slice %86 {offsets = [0, 96], sizes = [1, 32], strides = [1, 1]} : vector<1x128xf32> to vector<1x32xf32>
    %94 = math.tanh %93 : vector<1x32xf32>
    %95 = vector.extract_strided_slice %92 {offsets = [0, 32], sizes = [1, 32], strides = [1, 1]} : vector<1x96xf32> to vector<1x32xf32>
    %96 = arith.mulf %95, %80 : vector<1x32xf32>
    %97 = vector.extract_strided_slice %92 {offsets = [0, 0], sizes = [1, 32], strides = [1, 1]} : vector<1x96xf32> to vector<1x32xf32>
    %98 = arith.mulf %97, %94 : vector<1x32xf32>
    %99 = arith.addf %96, %98 : vector<1x32xf32>
    %100 = vector.extract_strided_slice %92 {offsets = [0, 64], sizes = [1, 32], strides = [1, 1]} : vector<1x96xf32> to vector<1x32xf32>
    %101 = math.tanh %99 : vector<1x32xf32>
    %102 = arith.mulf %100, %101 : vector<1x32xf32>
    %103 = vector.extract_strided_slice %23 {offsets = [4, 0], sizes = [1, 128], strides = [1, 1]} : vector<8x128xf32> to vector<1x128xf32>
    %cst_23 = arith.constant dense<0.000000e+00> : vector<1x128xf32>
    %104 = tpu.matmul %102, %24, %cst_23 {dimension_numbers = #tpu.dot_dimension_numbers<[1], [0], [0], [1], [0, 0, 1, 1], [], []>} : vector<1x32xf32>, vector<32x128xf32>, vector<1x128xf32> -> vector<1x128xf32>
    %105 = arith.addf %103, %104 : vector<1x128xf32>
    %106 = vector.extract_strided_slice %105 {offsets = [0, 0], sizes = [1, 96], strides = [1, 1]} : vector<1x128xf32> to vector<1x96xf32>
    %107 = arith.negf %106 : vector<1x96xf32>
    %108 = math.exp %107 : vector<1x96xf32>
    %cst_24 = arith.constant 1.000000e+00 : f32
    %109 = vector.broadcast %cst_24 : f32 to vector<1x96xf32>
    %110 = arith.addf %109, %108 : vector<1x96xf32>
    %111 = arith.divf %109, %110 : vector<1x96xf32>
    %112 = vector.extract_strided_slice %105 {offsets = [0, 96], sizes = [1, 32], strides = [1, 1]} : vector<1x128xf32> to vector<1x32xf32>
    %113 = math.tanh %112 : vector<1x32xf32>
    %114 = vector.extract_strided_slice %111 {offsets = [0, 32], sizes = [1, 32], strides = [1, 1]} : vector<1x96xf32> to vector<1x32xf32>
    %115 = arith.mulf %114, %99 : vector<1x32xf32>
    %116 = vector.extract_strided_slice %111 {offsets = [0, 0], sizes = [1, 32], strides = [1, 1]} : vector<1x96xf32> to vector<1x32xf32>
    %117 = arith.mulf %116, %113 : vector<1x32xf32>
    %118 = arith.addf %115, %117 : vector<1x32xf32>
    %119 = vector.extract_strided_slice %111 {offsets = [0, 64], sizes = [1, 32], strides = [1, 1]} : vector<1x96xf32> to vector<1x32xf32>
    %120 = math.tanh %118 : vector<1x32xf32>
    %121 = arith.mulf %119, %120 : vector<1x32xf32>
    %122 = vector.extract_strided_slice %23 {offsets = [5, 0], sizes = [1, 128], strides = [1, 1]} : vector<8x128xf32> to vector<1x128xf32>
    %cst_25 = arith.constant dense<0.000000e+00> : vector<1x128xf32>
    %123 = tpu.matmul %121, %24, %cst_25 {dimension_numbers = #tpu.dot_dimension_numbers<[1], [0], [0], [1], [0, 0, 1, 1], [], []>} : vector<1x32xf32>, vector<32x128xf32>, vector<1x128xf32> -> vector<1x128xf32>
    %124 = arith.addf %122, %123 : vector<1x128xf32>
    %125 = vector.extract_strided_slice %124 {offsets = [0, 0], sizes = [1, 96], strides = [1, 1]} : vector<1x128xf32> to vector<1x96xf32>
    %126 = arith.negf %125 : vector<1x96xf32>
    %127 = math.exp %126 : vector<1x96xf32>
    %cst_26 = arith.constant 1.000000e+00 : f32
    %128 = vector.broadcast %cst_26 : f32 to vector<1x96xf32>
    %129 = arith.addf %128, %127 : vector<1x96xf32>
    %130 = arith.divf %128, %129 : vector<1x96xf32>
    %131 = vector.extract_strided_slice %124 {offsets = [0, 96], sizes = [1, 32], strides = [1, 1]} : vector<1x128xf32> to vector<1x32xf32>
    %132 = math.tanh %131 : vector<1x32xf32>
    %133 = vector.extract_strided_slice %130 {offsets = [0, 32], sizes = [1, 32], strides = [1, 1]} : vector<1x96xf32> to vector<1x32xf32>
    %134 = arith.mulf %133, %118 : vector<1x32xf32>
    %135 = vector.extract_strided_slice %130 {offsets = [0, 0], sizes = [1, 32], strides = [1, 1]} : vector<1x96xf32> to vector<1x32xf32>
    %136 = arith.mulf %135, %132 : vector<1x32xf32>
    %137 = arith.addf %134, %136 : vector<1x32xf32>
    %138 = vector.extract_strided_slice %130 {offsets = [0, 64], sizes = [1, 32], strides = [1, 1]} : vector<1x96xf32> to vector<1x32xf32>
    %139 = math.tanh %137 : vector<1x32xf32>
    %140 = arith.mulf %138, %139 : vector<1x32xf32>
    %141 = vector.extract_strided_slice %23 {offsets = [6, 0], sizes = [1, 128], strides = [1, 1]} : vector<8x128xf32> to vector<1x128xf32>
    %cst_27 = arith.constant dense<0.000000e+00> : vector<1x128xf32>
    %142 = tpu.matmul %140, %24, %cst_27 {dimension_numbers = #tpu.dot_dimension_numbers<[1], [0], [0], [1], [0, 0, 1, 1], [], []>} : vector<1x32xf32>, vector<32x128xf32>, vector<1x128xf32> -> vector<1x128xf32>
    %143 = arith.addf %141, %142 : vector<1x128xf32>
    %144 = vector.extract_strided_slice %143 {offsets = [0, 0], sizes = [1, 96], strides = [1, 1]} : vector<1x128xf32> to vector<1x96xf32>
    %145 = arith.negf %144 : vector<1x96xf32>
    %146 = math.exp %145 : vector<1x96xf32>
    %cst_28 = arith.constant 1.000000e+00 : f32
    %147 = vector.broadcast %cst_28 : f32 to vector<1x96xf32>
    %148 = arith.addf %147, %146 : vector<1x96xf32>
    %149 = arith.divf %147, %148 : vector<1x96xf32>
    %150 = vector.extract_strided_slice %143 {offsets = [0, 96], sizes = [1, 32], strides = [1, 1]} : vector<1x128xf32> to vector<1x32xf32>
    %151 = math.tanh %150 : vector<1x32xf32>
    %152 = vector.extract_strided_slice %149 {offsets = [0, 32], sizes = [1, 32], strides = [1, 1]} : vector<1x96xf32> to vector<1x32xf32>
    %153 = arith.mulf %152, %137 : vector<1x32xf32>
    %154 = vector.extract_strided_slice %149 {offsets = [0, 0], sizes = [1, 32], strides = [1, 1]} : vector<1x96xf32> to vector<1x32xf32>
    %155 = arith.mulf %154, %151 : vector<1x32xf32>
    %156 = arith.addf %153, %155 : vector<1x32xf32>
    %157 = vector.extract_strided_slice %149 {offsets = [0, 64], sizes = [1, 32], strides = [1, 1]} : vector<1x96xf32> to vector<1x32xf32>
    %158 = math.tanh %156 : vector<1x32xf32>
    %159 = arith.mulf %157, %158 : vector<1x32xf32>
    %160 = vector.extract_strided_slice %23 {offsets = [7, 0], sizes = [1, 128], strides = [1, 1]} : vector<8x128xf32> to vector<1x128xf32>
    %cst_29 = arith.constant dense<0.000000e+00> : vector<1x128xf32>
    %161 = tpu.matmul %159, %24, %cst_29 {dimension_numbers = #tpu.dot_dimension_numbers<[1], [0], [0], [1], [0, 0, 1, 1], [], []>} : vector<1x32xf32>, vector<32x128xf32>, vector<1x128xf32> -> vector<1x128xf32>
    %162 = arith.addf %160, %161 : vector<1x128xf32>
    %163 = vector.extract_strided_slice %162 {offsets = [0, 0], sizes = [1, 96], strides = [1, 1]} : vector<1x128xf32> to vector<1x96xf32>
    %164 = arith.negf %163 : vector<1x96xf32>
    %165 = math.exp %164 : vector<1x96xf32>
    %cst_30 = arith.constant 1.000000e+00 : f32
    %166 = vector.broadcast %cst_30 : f32 to vector<1x96xf32>
    %167 = arith.addf %166, %165 : vector<1x96xf32>
    %168 = arith.divf %166, %167 : vector<1x96xf32>
    %169 = vector.extract_strided_slice %162 {offsets = [0, 96], sizes = [1, 32], strides = [1, 1]} : vector<1x128xf32> to vector<1x32xf32>
    %170 = math.tanh %169 : vector<1x32xf32>
    %171 = vector.extract_strided_slice %168 {offsets = [0, 32], sizes = [1, 32], strides = [1, 1]} : vector<1x96xf32> to vector<1x32xf32>
    %172 = arith.mulf %171, %156 : vector<1x32xf32>
    %173 = vector.extract_strided_slice %168 {offsets = [0, 0], sizes = [1, 32], strides = [1, 1]} : vector<1x96xf32> to vector<1x32xf32>
    %174 = arith.mulf %173, %170 : vector<1x32xf32>
    %175 = arith.addf %172, %174 : vector<1x32xf32>
    %176 = vector.extract_strided_slice %168 {offsets = [0, 64], sizes = [1, 32], strides = [1, 1]} : vector<1x96xf32> to vector<1x32xf32>
    %177 = math.tanh %175 : vector<1x32xf32>
    %178 = arith.mulf %176, %177 : vector<1x32xf32>
    %179 = tpu.concatenate %45, %64, %83, %102, %121, %140, %159, %178 in 0 : vector<1x32xf32>, vector<1x32xf32>, vector<1x32xf32>, vector<1x32xf32>, vector<1x32xf32>, vector<1x32xf32>, vector<1x32xf32>, vector<1x32xf32> -> vector<8x32xf32>
    %c0_31 = arith.constant 0 : index
    %c0_32 = arith.constant 0 : index
    %180 = vector.load %arg6[%c0_31, %c0_32] : memref<32x4xf32, #tpu.memory_space<vmem>>, vector<32x4xf32>
    %cst_33 = arith.constant dense<0.000000e+00> : vector<8x4xf32>
    %181 = tpu.matmul %179, %180, %cst_33 {dimension_numbers = #tpu.dot_dimension_numbers<[1], [0], [0], [1], [0, 0, 1, 1], [], []>} : vector<8x32xf32>, vector<32x4xf32>, vector<8x4xf32> -> vector<8x4xf32>
    %c0_34 = arith.constant 0 : index
    %c0_35 = arith.constant 0 : index
    %182 = vector.load %arg7[%c0_34, %c0_35] : memref<1x4xf32, #tpu.memory_space<vmem>>, vector<1x4xf32>
    %183 = vector.broadcast %182 : vector<1x4xf32> to vector<8x4xf32>
    %184 = arith.addf %181, %183 : vector<8x4xf32>
    %c0_36 = arith.constant 0 : index
    %c0_37 = arith.constant 0 : index
    %185 = vector.load %arg8[%c0_36, %c0_37] : memref<8x4xf32, #tpu.memory_space<vmem>>, vector<8x4xf32>
    tpu.vector_store %arg8[%c0_36, %c0_37], %184 {strides = array<i32>} : memref<8x4xf32, #tpu.memory_space<vmem>>, vector<8x4xf32>,
    return
  }
}

</mosaic_0001>

<bundles_post_ra>
// kernel: tpu_custom_call.1
= control target key start
LH: loop header
LB: loop body
LE: loop exit
PB: predicated region body
PF: predicated region fallthrough
CT: control target
= control target key end

     0   :  { %13 = vsyncpa [#allocation3], 0  ;;  %s1827_s0 = inlined_call_operand.vmem [shape: f32[8,16], index: 0, kind: input, shape index: {}]   ;;  %s1828_s1 = inlined_call_operand.hbm [shape: f32[16,128], index: 1, kind: input, shape index: {}]   ;;  %s1829_s2 = inlined_call_operand.vmem [shape: f32[1,128], index: 2, kind: input, shape index: {}]   ;;  %s1830_s3 = inlined_call_operand.vmem [shape: f32[32,128], index: 3, kind: input, shape index: {}]   ;;  %s1831_s4 = inlined_call_operand.hbm [shape: f32[32,128], index: 4, kind: input, shape index: {}]   ;;  %s1832_s5 = inlined_call_operand.vmem [shape: f32[1,128], index: 5, kind: input, shape index: {}]   ;;  %s1833_s6 = inlined_call_operand.vmem [shape: f32[32,4], index: 6, kind: input, shape index: {}]   ;;  %s1834_s7 = inlined_call_operand.vmem [shape: f32[1,4], index: 7, kind: input, shape index: {}]   ;;  %s1835_s8 = inlined_call_operand.vmem [shape: f32[8,4], index: 8, kind: output, shape index: {}]  }
   0x1   :  { %14 = vsyncpa [#allocation5], 0  ;;  %s1588_s27 = smov [#allocation2]   ;;  %s1540_s9 = scalar_lea.hbm %s1828_s1, 256 }
   0x2   :  { %s22_s28 = sshll.u32 %s1588_s27, 4  ;;  %p1541_p0 = scmp.ne.s32.totalorder %s1828_s1, %s1540_s9  ;;  %s23_s28 = int_to_ptr.vmem [resolvable:$true] %s22_s28 }
   0x3   :  { %p1544_p1 = scmp.lt.u32.totalorder %s1540_s9, %s1828_s1 }
   0x5   :  { %p1546_p2 = pnand %p1544_p1, %p1541_p0 }
   0x7   :  { %1549 = shalt.err (!%p1546_p2)
}
   0x8   :  { %s1550_s14 = scalar_lea.vmem %s23_s28, 256  ;;  %p1555_p4 = scmp.lt.s32.totalorder %s23_s28, %s23_s28 }
   0x9   :  { %p1551_p3 = scmp.ne.s32.totalorder %s23_s28, %s1550_s14  ;;  %p1556_p5 = scmp.lt.s32.totalorder %s1550_s14, %s1550_s14 }
   0xb   :  { %p1557_p6 = por %p1556_p5, %p1555_p4 }
   0xd   :  { %p1558_p7 = pnand %p1557_p6, %p1551_p3 }
   0xf   :  { %1561 = shalt.err (!%p1558_p7)
}
  0x10   :  { %s1589_s15 = smov 128   ;;  %s1590_s16 = smov 8  }
  0x11   :  { %28 = dma.hbm_to_vmem [thread:$0]  %s1828_s1, 256, %s23_s28, [#allocation3], %s1589_s15, %s1589_s15, %s1590_s16  }
  0x12   :  { %s1591_s19 = smov [#allocation4]   ;;  %s1562_s23 = scalar_lea.hbm %s1831_s4, 512 }
  0x13   :  { %s38_s20 = sshll.u32 %s1591_s19, 4  ;;  %p1563_p8 = scmp.ne.s32.totalorder %s1831_s4, %s1562_s23  ;;  %s39_s20 = int_to_ptr.vmem [resolvable:$true] %s38_s20 }
  0x14   :  { %p1566_p9 = scmp.lt.u32.totalorder %s1562_s23, %s1831_s4 }
  0x16   :  { %p1568_p10 = pnand %p1566_p9, %p1563_p8 }
  0x18   :  { %1571 = shalt.err (!%p1568_p10)
}
  0x19   :  { %s1572_s29 = scalar_lea.vmem %s39_s20, 512  ;;  %p1577_p12 = scmp.lt.s32.totalorder %s39_s20, %s39_s20 }
  0x1a   :  { %p1573_p11 = scmp.ne.s32.totalorder %s39_s20, %s1572_s29  ;;  %p1578_p13 = scmp.lt.s32.totalorder %s1572_s29, %s1572_s29 }
  0x1c   :  { %p1579_p0 = por %p1578_p13, %p1577_p12 }
  0x1e   :  { %p1580_p1 = pnand %p1579_p0, %p1573_p11 }
  0x20   :  { %1583 = shalt.err (!%p1580_p1)
}
  0x21   :  { %44 = dma.hbm_to_vmem [thread:$0]  %s1831_s4, 512, %s39_s20, [#allocation5], %s1589_s15, %s1589_s15, %s1590_s16  }
  0x22   :  { %1584 = dma.done.wait [#allocation3], 256  }
  0x23   :  { %1585 = vsyncadd [#allocation3], 4294967040 }
  0x24   :  { %1586 = dma.done.wait [#allocation5], 512  }
  0x25   :  { %1587 = vsyncadd [#allocation5], 4294966784  ;;  %v1592_v0 = vmov 0.0|0.0   ;;  %vm1593_vm0 = vmmov 0   ;;  %v1594_v1 = vmov 0.0   ;;  %v58_v2 = vld [vmem:[#allocation2] sm:$0xff] }
  0x26   :  { %1396 = vmatprep.subr.bf16.mxu0 %v1592_v0  ;;  %1283 = vmatprep.mubr.msk.f32.mxu0 %vm1593_vm0, %v1594_v1  ;;  %v59_v3 = vld [vmem:[#allocation2 + $0x8] sm:$0xff]  ;;  %v57_v5 = vld [vmem:[%s1827_s0] sm:$0xff]  ;;  %vm67_vm1 = vcmask 130048   ;;  %s1595_s11 = smov 32   ;;  %v246_v19 = vld [vmem:[#allocation4] sm:$0xff]  ;;  %vm173_vm2 = vcmask 261120  }
  0x27   :  { %1399 = vmatprep.subr.bf16.mxu1 %v1592_v0  ;;  %1294 = vmatprep.mubr.msk.f32.mxu1 %vm1593_vm0, %v1594_v1  ;;  %v1397_v4 = vpack.c.bf16 %v59_v3, %v58_v2  ;;  %v1204_v6 = vld [vmem:[%s1829_s2] ss:$0 sm:$0xff]  ;;  %v160_v18 = vld [vmem:[%s1830_s3 + $0x8] sm:$0xff]  ;;  %v247_v21 = vld [vmem:[#allocation4 + $0x8] sm:$0xff]  ;;  %vm1096_vm3 = vcmask 1040384   ;;  %vm1098_vm4 = vcmask 1041408  }
  0x28   :  { %v159_v17 = vld [vmem:[%s1830_s3] sm:$0xff]  ;;  %v161_v22 = vld [vmem:[%s1830_s3 + $0x10] sm:$0xff]  ;;  %v162_v23 = vld [vmem:[%s1830_s3 + $0x18] sm:$0xff]  ;;  %v1694_v24 = vpack.c.bf16 %v247_v21, %v246_v19  ;;  %s1596_s3 = smov 64   ;;  %vm1100_vm5 = vcmask 1042432   ;;  %vm1102_vm6 = vcmask 1043456  }
  0x29   :  { %1398 = vmatpush3.bf16.msra.mxu0 %v1397_v4  ;;  %v1400_v20 = vpack.c.bf16 %v160_v18, %v159_v17  ;;  %v248_v25 = vld [vmem:[#allocation4 + $0x10] sm:$0xff]  ;;  %v249_v26 = vld [vmem:[#allocation4 + $0x18] sm:$0xff]  ;;  %v1403_v27 = vpack.c.bf16 %v162_v23, %v161_v22  ;;  %vm1104_vm7 = vcmask 1044480   ;;  %vm1106_vm8 = vcmask 1045504  }
  0x2a   :  { %1405 = vmatprep.subr.bf16.mxu0 %v1592_v0  ;;  %v1698_v28 = vpack.c.bf16 %v249_v26, %v248_v25  ;;  %v1207_v35 = vld [vmem:[%s1832_s5] ss:$0 sm:$0xff]  ;;  %vm1108_vm9 = vcmask 1046528   ;;  %vm1196_vm10 = vcmask 31744  }
  0x2b   :  { %1401 = vmatpush3.bf16.msra.mxu1 %v1400_v20 }
  0x2c   :  { %1284 = vmatmul.mubr.msk.f32.vlgmr.msra.gmra.mrb[0].mxu0 %vm67_vm1, %v57_v5  ;;  %1402 = vmatprep.subr.bf16.mxu1 %v1592_v0 }
  0x2d   :  { %1305 = vmatprep.mubr.msk.f32.mxu0 %vm1593_vm0, %v1594_v1  ;;  %1407 = vmatpush3.bf16.msra.mxu0 %v1694_v24 }
  0x2e   :  { %1408 = vmatprep.subr.bf16.mxu0 %v1592_v0 }
  0x2f   :  { %1404 = vmatpush3.bf16.msra.mxu1 %v1403_v27 }
  0x30   :  { %1411 = vmatprep.subr.bf16.mxu1 %v1592_v0 }
  0x31   :  { %1410 = vmatpush3.bf16.msra.mxu0 %v1698_v28 }
  0x32   :  { %1417 = vmatprep.subr.bf16.mxu0 %v1592_v0 }
  0x34   :  { %1306 = vmatmul.mubr.f32.vlgmr.msra.gmra.mrb[2].mxu0 %v1594_v1 }
  0x35   :  { %1419 = vmatpush3.bf16.msra.mxu0 %v1694_v24  ;;  %1327 = vmatprep.mubr.msk.f32.mxu0 %vm1593_vm0, %v1594_v1 }
  0x36   :  { %1420 = vmatprep.subr.bf16.mxu0 %v1592_v0 }
  0x39   :  { %1422 = vmatpush3.bf16.msra.mxu0 %v1698_v28 }
  0x3a   :  { %1429 = vmatprep.subr.bf16.mxu0 %v1592_v0 }
  0xff   :  { %v137_v7 = vpop.f32.mrb[0].mxu0 }
 0x100   :  { %v138_v8 = vadd.f32 %v1204_v6, %v137_v7  ;;  %v1285_v9 = vpop.f32.mrb[1].mxu0 }
 0x102   :  { %1468 = vtanh.f32 %v138_v8  ;;  %v1206_v11 = vmul.f32 -1.442695, %v138_v8 }
 0x104   :  { %1470 = vpow2.f32 %v1206_v11 }
 0x107   :  { %v319_v33 = vpop.f32.mrb[2].mxu0 }
 0x108   :  { %v1307_v34 = vpop.f32.mrb[3].mxu0 }
 0x10c   :  { %v1469_v10 = vpop.eup %1468 }
 0x10d   :  { %149 = vrot.lane.b32.xlu0 %v1469_v10, %s1595_s11 }
 0x10e   :  { %v1471_v12 = vpop.eup %1470 }
 0x10f   :  { %v144_v13 = vadd.f32 1.0, %v1471_v12 }
 0x111   :  { %1472 = vrcp.f32 %v144_v13 }
 0x11b   :  { %v1473_v14 = vpop.eup %1472 }
 0x17f   :  { %v150_v15 = vpop.permute.xlu0 %149 }
 0x180   :  { %v152_v16 = vmul.f32 %v1473_v14, %v150_v15 }
 0x182   :  { %1474 = vtanh.f32 %v152_v16 }
 0x18c   :  { %v1475_v29 = vpop.eup %1474 }
 0x18d   :  { %155 = vrot.lane.b32.xlu0 %v1475_v29, %s1596_s3 }
 0x1ff   :  { %v156_v30 = vpop.permute.xlu0 %155 }
 0x200   :  { %v158_v31 = vmul.f32 %v1473_v14, %v156_v30 }
 0x202   :  { %171 = vrot.lane.b32.xlu1 %v158_v31, %s1596_s3 }
 0x274   :  { %v172_v32 = vpop.permute.xlu1 %171 }
 0x275   :  { %1295 = vmatmul.mubr.msk.f32.vlgmr.msra.gmra.mrb[0].mxu1 %vm173_vm2, %v172_v32 }
 0x276   :  { %1413 = vmatpush3.bf16.msra.mxu1 %v1694_v24  ;;  %1316 = vmatprep.mubr.msk.f32.mxu1 %vm1593_vm0, %v1594_v1 }
 0x277   :  { %1414 = vmatprep.subr.bf16.mxu1 %v1592_v0 }
 0x27a   :  { %1416 = vmatpush3.bf16.msra.mxu1 %v1698_v28 }
 0x27b   :  { %1423 = vmatprep.subr.bf16.mxu1 %v1592_v0 }
 0x348   :  { %v242_v36 = vpop.f32.mrb[0].mxu1 }
 0x349   :  { %v1723_v37 = vadd.f32 %v1207_v35, %v242_v36  ;;  %v1296_v38 = vpop.f32.mrb[1].mxu1 }
 0x34b   :  { %v323_v39 = vadd.f32 %v319_v33, %v1723_v37 }
 0x34d   :  { %1476 = vtanh.f32 %v323_v39  ;;  %v1209_v41 = vmul.f32 -1.442695, %v323_v39 }
 0x34f   :  { %1478 = vpow2.f32 %v1209_v41 }
 0x357   :  { %v1477_v40 = vpop.eup %1476 }
 0x358   :  { %333 = vrot.lane.b32.xlu1 %v1477_v40, %s1595_s11 }
 0x359   :  { %v1479_v42 = vpop.eup %1478 }
 0x35a   :  { %v327_v43 = vadd.f32 1.0, %v1479_v42 }
 0x35c   :  { %1480 = vrcp.f32 %v327_v43 }
 0x366   :  { %v1481_v44 = vpop.eup %1480 }
 0x367   :  { %v331_v47 = vmul.f32 0.0, %v1481_v44 }
 0x3ca   :  { %v334_v45 = vpop.permute.xlu1 %333 }
 0x3cb   :  { %v336_v46 = vmul.f32 %v1481_v44, %v334_v45 }
 0x3cd   :  { %338 = vrot.lane.b32.xlu0 %v336_v46, %s1595_s11 }
 0x43f   :  { %v339_v48 = vpop.permute.xlu0 %338 }
 0x440   :  { %v341_v49 = vadd.f32 %v339_v48, %v331_v47 }
 0x442   :  { %1482 = vtanh.f32 %v341_v49  ;;  %v435_v3 = vrot.slane %v341_v49, 7 }
 0x44c   :  { %v1483_v50 = vpop.eup %1482 }
 0x44d   :  { %344 = vrot.lane.b32.xlu1 %v1483_v50, %s1595_s11 }
 0x4bf   :  { %v345_v51 = vpop.permute.xlu1 %344 }
 0x4c0   :  { %v1729_v52 = vmul.f32 %v1481_v44, %v345_v51 }
 0x4c2   :  { %349 = vrot.lane.b32.xlu0 %v1729_v52, %s1596_s3 }
 0x534   :  { %v350_v53 = vpop.permute.xlu0 %349 }
 0x535   :  { %1317 = vmatmul.mubr.msk.f32.vlgmr.msra.gmra.mrb[2].mxu1 %vm173_vm2, %v350_v53 }
 0x536   :  { %1425 = vmatpush3.bf16.msra.mxu1 %v1694_v24  ;;  %1338 = vmatprep.mubr.msk.f32.mxu1 %vm1593_vm0, %v1594_v1 }
 0x537   :  { %1426 = vmatprep.subr.bf16.mxu1 %v1592_v0 }
 0x53a   :  { %1428 = vmatpush3.bf16.msra.mxu1 %v1698_v28 }
 0x53b   :  { %1435 = vmatprep.subr.bf16.mxu1 %v1592_v0 }
 0x608   :  { %v419_v54 = vpop.f32.mrb[2].mxu1 }
 0x609   :  { %v424_v55 = vrot.slane %v419_v54, 7  ;;  %v1318_v56 = vpop.f32.mrb[3].mxu1 }
 0x60b   :  { %v426_v57 = vadd.f32 %v424_v55, %v1723_v37 }
 0x60d   :  { %1484 = vtanh.f32 %v426_v57  ;;  %v1211_v59 = vmul.f32 -1.442695, %v426_v57 }
 0x60f   :  { %1486 = vpow2.f32 %v1211_v59 }
 0x617   :  { %v1485_v58 = vpop.eup %1484 }
 0x618   :  { %439 = vrot.lane.b32.xlu1 %v1485_v58, %s1595_s11 }
 0x619   :  { %v1487_v60 = vpop.eup %1486 }
 0x61a   :  { %v430_v61 = vadd.f32 1.0, %v1487_v60 }
 0x61c   :  { %1488 = vrcp.f32 %v430_v61 }
 0x626   :  { %v1489_v62 = vpop.eup %1488 }
 0x627   :  { %v437_v4 = vmul.f32 %v1489_v62, %v435_v3 }
 0x68a   :  { %v440_v63 = vpop.permute.xlu1 %439 }
 0x68b   :  { %v442_v2 = vmul.f32 %v1489_v62, %v440_v63 }
 0x68d   :  { %444 = vrot.lane.b32.xlu0 %v442_v2, %s1595_s11 }
 0x6ff   :  { %v445_v5 = vpop.permute.xlu0 %444 }
 0x700   :  { %v447_v6 = vadd.f32 %v445_v5, %v437_v4 }
 0x702   :  { %1490 = vtanh.f32 %v447_v6  ;;  %v542_v23 = vrot.slane %v447_v6, 7 }
 0x70c   :  { %v1491_v7 = vpop.eup %1490 }
 0x70d   :  { %450 = vrot.lane.b32.xlu1 %v1491_v7, %s1595_s11 }
 0x77f   :  { %v451_v8 = vpop.permute.xlu1 %450 }
 0x780   :  { %v453_v9 = vmul.f32 %v1489_v62, %v451_v8 }
 0x782   :  { %v455_v10 = vrot.slane %v453_v9, 1  ;;  %v1097_v32 = vsel %vm1096_vm3, %v1729_v52, %v453_v9 }
 0x784   :  { %456 = vrot.lane.b32.xlu0 %v455_v10, %s1596_s3 }
 0x7f6   :  { %v457_v11 = vpop.permute.xlu0 %456 }
 0x7f7   :  { %1328 = vmatmul.mubr.msk.f32.vlgmr.msra.gmra.mrb[4].mxu0 %vm173_vm2, %v457_v11 }
 0x7f8   :  { %1431 = vmatpush3.bf16.msra.mxu0 %v1694_v24  ;;  %1349 = vmatprep.mubr.msk.f32.mxu0 %vm1593_vm0, %v1594_v1 }
 0x7f9   :  { %1432 = vmatprep.subr.bf16.mxu0 %v1592_v0 }
 0x7fc   :  { %1434 = vmatpush3.bf16.msra.mxu0 %v1698_v28 }
 0x7fd   :  { %1441 = vmatprep.subr.bf16.mxu0 %v1592_v0 }
 0x8ca   :  { %v526_v12 = vpop.f32.mrb[4].mxu0 }
 0x8cb   :  { %v531_v13 = vrot.slane %v526_v12, 6  ;;  %v1329_v14 = vpop.f32.mrb[5].mxu0 }
 0x8cd   :  { %v533_v15 = vadd.f32 %v531_v13, %v1723_v37 }
 0x8cf   :  { %1492 = vtanh.f32 %v533_v15  ;;  %v1213_v17 = vmul.f32 -1.442695, %v533_v15 }
 0x8d1   :  { %1494 = vpow2.f32 %v1213_v17 }
 0x8d9   :  { %v1493_v16 = vpop.eup %1492 }
 0x8da   :  { %546 = vrot.lane.b32.xlu1 %v1493_v16, %s1595_s11 }
 0x8db   :  { %v1495_v18 = vpop.eup %1494 }
 0x8dc   :  { %v537_v19 = vadd.f32 1.0, %v1495_v18 }
 0x8de   :  { %1496 = vrcp.f32 %v537_v19 }
 0x8e8   :  { %v1497_v20 = vpop.eup %1496 }
 0x8e9   :  { %v544_v25 = vmul.f32 %v1497_v20, %v542_v23 }
 0x94c   :  { %v547_v21 = vpop.permute.xlu1 %546 }
 0x94d   :  { %v549_v22 = vmul.f32 %v1497_v20, %v547_v21 }
 0x94f   :  { %551 = vrot.lane.b32.xlu0 %v549_v22, %s1595_s11 }
 0x9c1   :  { %v552_v26 = vpop.permute.xlu0 %551 }
 0x9c2   :  { %v554_v27 = vadd.f32 %v552_v26, %v544_v25 }
 0x9c4   :  { %1498 = vtanh.f32 %v554_v27  ;;  %v649_v48 = vrot.slane %v554_v27, 7 }
 0x9ce   :  { %v1499_v29 = vpop.eup %1498 }
 0x9cf   :  { %557 = vrot.lane.b32.xlu1 %v1499_v29, %s1595_s11 }
 0xa41   :  { %v558_v30 = vpop.permute.xlu1 %557 }
 0xa42   :  { %v560_v31 = vmul.f32 %v1497_v20, %v558_v30 }
 0xa44   :  { %v562_v33 = vrot.slane %v560_v31, 2  ;;  %v1099_v34 = vsel %vm1098_vm4, %v1097_v32, %v560_v31 }
 0xa46   :  { %563 = vrot.lane.b32.xlu0 %v562_v33, %s1596_s3 }
 0xab8   :  { %v564_v35 = vpop.permute.xlu0 %563 }
 0xab9   :  { %1339 = vmatmul.mubr.msk.f32.vlgmr.msra.gmra.mrb[4].mxu1 %vm173_vm2, %v564_v35 }
 0xaba   :  { %1437 = vmatpush3.bf16.msra.mxu1 %v1694_v24  ;;  %1360 = vmatprep.mubr.msk.f32.mxu1 %vm1593_vm0, %v1594_v1 }
 0xabb   :  { %1438 = vmatprep.subr.bf16.mxu1 %v1592_v0 }
 0xabe   :  { %1440 = vmatpush3.bf16.msra.mxu1 %v1698_v28 }
 0xabf   :  { %1447 = vmatprep.subr.bf16.mxu1 %v1592_v0 }
 0xb8c   :  { %v633_v36 = vpop.f32.mrb[4].mxu1 }
 0xb8d   :  { %v638_v38 = vrot.slane %v633_v36, 5  ;;  %v1340_v39 = vpop.f32.mrb[5].mxu1 }
 0xb8f   :  { %v640_v40 = vadd.f32 %v638_v38, %v1723_v37 }
 0xb91   :  { %1500 = vtanh.f32 %v640_v40  ;;  %v1215_v42 = vmul.f32 -1.442695, %v640_v40 }
 0xb93   :  { %1502 = vpow2.f32 %v1215_v42 }
 0xb9b   :  { %v1501_v41 = vpop.eup %1500 }
 0xb9c   :  { %653 = vrot.lane.b32.xlu1 %v1501_v41, %s1595_s11 }
 0xb9d   :  { %v1503_v43 = vpop.eup %1502 }
 0xb9e   :  { %v644_v44 = vadd.f32 1.0, %v1503_v43 }
 0xba0   :  { %1504 = vrcp.f32 %v644_v44 }
 0xbaa   :  { %v1505_v45 = vpop.eup %1504 }
 0xbab   :  { %v651_v49 = vmul.f32 %v1505_v45, %v649_v48 }
 0xc0e   :  { %v654_v46 = vpop.permute.xlu1 %653 }
 0xc0f   :  { %v656_v47 = vmul.f32 %v1505_v45, %v654_v46 }
 0xc11   :  { %658 = vrot.lane.b32.xlu0 %v656_v47, %s1595_s11 }
 0xc83   :  { %v659_v50 = vpop.permute.xlu0 %658 }
 0xc84   :  { %v661_v51 = vadd.f32 %v659_v50, %v651_v49 }
 0xc86   :  { %1506 = vtanh.f32 %v661_v51  ;;  %v756_v7 = vrot.slane %v661_v51, 7 }
 0xc90   :  { %v1507_v52 = vpop.eup %1506 }
 0xc91   :  { %664 = vrot.lane.b32.xlu1 %v1507_v52, %s1595_s11 }
 0xd03   :  { %v665_v53 = vpop.permute.xlu1 %664 }
 0xd04   :  { %v667_v54 = vmul.f32 %v1505_v45, %v665_v53 }
 0xd06   :  { %v669_v55 = vrot.slane %v667_v54, 3  ;;  %v1101_v56 = vsel %vm1100_vm5, %v1099_v34, %v667_v54 }
 0xd08   :  { %670 = vrot.lane.b32.xlu0 %v669_v55, %s1596_s3 }
 0xd7a   :  { %v671_v57 = vpop.permute.xlu0 %670 }
 0xd7b   :  { %1350 = vmatmul.mubr.msk.f32.vlgmr.msra.gmra.mrb[6].mxu0 %vm173_vm2, %v671_v57 }
 0xd7c   :  { %1443 = vmatpush3.bf16.msra.mxu0 %v1694_v24  ;;  %1371 = vmatprep.mubr.msk.f32.mxu0 %vm1593_vm0, %v1594_v1 }
 0xd7d   :  { %1444 = vmatprep.subr.bf16.mxu0 %v1592_v0 }
 0xd80   :  { %1446 = vmatpush3.bf16.msra.mxu0 %v1698_v28 }
 0xd81   :  { %1453 = vmatprep.subr.bf16.mxu0 %v1592_v0 }
 0xe4e   :  { %v740_v58 = vpop.f32.mrb[6].mxu0 }
 0xe4f   :  { %v745_v59 = vrot.slane %v740_v58, 4  ;;  %v1351_v60 = vpop.f32.mrb[7].mxu0 }
 0xe51   :  { %v747_v61 = vadd.f32 %v745_v59, %v1723_v37 }
 0xe53   :  { %1508 = vtanh.f32 %v747_v61  ;;  %v1217_v63 = vmul.f32 -1.442695, %v747_v61 }
 0xe55   :  { %1510 = vpow2.f32 %v1217_v63 }
 0xe5d   :  { %v1509_v62 = vpop.eup %1508 }
 0xe5e   :  { %760 = vrot.lane.b32.xlu1 %v1509_v62, %s1595_s11 }
 0xe5f   :  { %v1511_v2 = vpop.eup %1510 }
 0xe60   :  { %v751_v3 = vadd.f32 1.0, %v1511_v2 }
 0xe62   :  { %1512 = vrcp.f32 %v751_v3 }
 0xe6c   :  { %v1513_v4 = vpop.eup %1512 }
 0xe6d   :  { %v758_v8 = vmul.f32 %v1513_v4, %v756_v7 }
 0xed0   :  { %v761_v5 = vpop.permute.xlu1 %760 }
 0xed1   :  { %v763_v6 = vmul.f32 %v1513_v4, %v761_v5 }
 0xed3   :  { %765 = vrot.lane.b32.xlu0 %v763_v6, %s1595_s11 }
 0xf45   :  { %v766_v9 = vpop.permute.xlu0 %765 }
 0xf46   :  { %v768_v10 = vadd.f32 %v766_v9, %v758_v8 }
 0xf48   :  { %1514 = vtanh.f32 %v768_v10 }
 0xf52   :  { %v1515_v11 = vpop.eup %1514 }
 0xf53   :  { %771 = vrot.lane.b32.xlu1 %v1515_v11, %s1595_s11 }
 0xfc5   :  { %v772_v12 = vpop.permute.xlu1 %771 }
 0xfc6   :  { %v774_v13 = vmul.f32 %v1513_v4, %v772_v12  ;;  %v1111_v12 = vld [vmem:[%s1833_s6 + $0x8] sm:$0xff] }
 0xfc8   :  { %v776_v14 = vrot.slane %v774_v13, 4  ;;  %v1103_v15 = vsel %vm1102_vm6, %v1101_v56, %v774_v13  ;;  %v1112_v13 = vld [vmem:[%s1833_s6 + $0x10] sm:$0xff] }
 0xfca   :  { %777 = vrot.lane.b32.xlu0 %v776_v14, %s1596_s3 }
0x103c   :  { %v778_v16 = vpop.permute.xlu0 %777 }
0x103d   :  { %1361 = vmatmul.mubr.msk.f32.vlgmr.msra.gmra.mrb[6].mxu1 %vm173_vm2, %v778_v16 }
0x103e   :  { %1449 = vmatpush3.bf16.msra.mxu1 %v1694_v24  ;;  %1382 = vmatprep.mubr.msk.f32.mxu1 %vm1593_vm0, %v1594_v1 }
0x103f   :  { %1450 = vmatprep.subr.bf16.mxu1 %v1592_v0 }
0x1042   :  { %1452 = vmatpush3.bf16.msra.mxu1 %v1698_v28  ;;  %v863_v28 = vrot.slane %v768_v10, 7 }
0x1110   :  { %v847_v17 = vpop.f32.mrb[6].mxu1 }
0x1111   :  { %v852_v18 = vrot.slane %v847_v17, 3  ;;  %v1362_v19 = vpop.f32.mrb[7].mxu1 }
0x1113   :  { %v854_v20 = vadd.f32 %v852_v18, %v1723_v37 }
0x1115   :  { %1516 = vtanh.f32 %v854_v20  ;;  %v1219_v22 = vmul.f32 -1.442695, %v854_v20 }
0x1117   :  { %1518 = vpow2.f32 %v1219_v22  ;;  %v1224_v22 = vld [vmem:[%s1834_s7] ss:$0 sm:$0xff] }
0x111f   :  { %v1517_v21 = vpop.eup %1516 }
0x1120   :  { %867 = vrot.lane.b32.xlu1 %v1517_v21, %s1595_s11 }
0x1121   :  { %v1519_v23 = vpop.eup %1518 }
0x1122   :  { %v858_v24 = vadd.f32 1.0, %v1519_v23 }
0x1124   :  { %1520 = vrcp.f32 %v858_v24 }
0x112e   :  { %v1521_v25 = vpop.eup %1520 }
0x112f   :  { %v865_v29 = vmul.f32 %v1521_v25, %v863_v28 }
0x1192   :  { %v868_v26 = vpop.permute.xlu1 %867 }
0x1193   :  { %v870_v27 = vmul.f32 %v1521_v25, %v868_v26 }
0x1195   :  { %872 = vrot.lane.b32.xlu0 %v870_v27, %s1595_s11 }
0x1207   :  { %v873_v30 = vpop.permute.xlu0 %872 }
0x1208   :  { %v875_v31 = vadd.f32 %v873_v30, %v865_v29 }
0x120a   :  { %1522 = vtanh.f32 %v875_v31 }
0x1214   :  { %v1523_v32 = vpop.eup %1522 }
0x1215   :  { %878 = vrot.lane.b32.xlu1 %v1523_v32, %s1595_s11 }
0x1287   :  { %v879_v33 = vpop.permute.xlu1 %878 }
0x1288   :  { %v881_v34 = vmul.f32 %v1521_v25, %v879_v33 }
0x128a   :  { %v883_v35 = vrot.slane %v881_v34, 5  ;;  %v1105_v36 = vsel %vm1104_vm7, %v1103_v15, %v881_v34  ;;  %v1113_v15 = vld [vmem:[%s1833_s6 + $0x18] sm:$0xff] }
0x128b   :  { %v1457_v16 = vpack.c.bf16 %v1113_v15, %v1112_v13 }
0x128c   :  { %884 = vrot.lane.b32.xlu0 %v883_v35, %s1596_s3 }
0x12fe   :  { %v885_v38 = vpop.permute.xlu0 %884 }
0x12ff   :  { %1372 = vmatmul.mubr.msk.f32.vlgmr.msra.gmra.mrb[8].mxu0 %vm173_vm2, %v885_v38 }
0x1300   :  { %1393 = vmatprep.mubr.msk.f32.mxu0 %vm1593_vm0, %v1594_v1  ;;  %v970_v1 = vrot.slane %v875_v31, 7 }
0x13d2   :  { %v954_v39 = vpop.f32.mrb[8].mxu0 }
0x13d3   :  { %v959_v40 = vrot.slane %v954_v39, 2  ;;  %v1373_v41 = vpop.f32.mrb[9].mxu0 }
0x13d5   :  { %v961_v42 = vadd.f32 %v959_v40, %v1723_v37 }
0x13d7   :  { %1524 = vtanh.f32 %v961_v42  ;;  %v1221_v44 = vmul.f32 -1.442695, %v961_v42 }
0x13d9   :  { %1526 = vpow2.f32 %v1221_v44 }
0x13e1   :  { %v1525_v43 = vpop.eup %1524 }
0x13e2   :  { %974 = vrot.lane.b32.xlu1 %v1525_v43, %s1595_s11 }
0x13e3   :  { %v1527_v45 = vpop.eup %1526 }
0x13e4   :  { %v965_v46 = vadd.f32 1.0, %v1527_v45 }
0x13e6   :  { %1528 = vrcp.f32 %v965_v46 }
0x13f0   :  { %v1529_v47 = vpop.eup %1528 }
0x13f1   :  { %v972_v50 = vmul.f32 %v1529_v47, %v970_v1 }
0x1454   :  { %v975_v48 = vpop.permute.xlu1 %974 }
0x1455   :  { %v977_v49 = vmul.f32 %v1529_v47, %v975_v48 }
0x1457   :  { %979 = vrot.lane.b32.xlu0 %v977_v49, %s1595_s11 }
0x14c9   :  { %v980_v51 = vpop.permute.xlu0 %979 }
0x14ca   :  { %v982_v52 = vadd.f32 %v980_v51, %v972_v50 }
0x14cc   :  { %1530 = vtanh.f32 %v982_v52  ;;  %v1077_v8 = vrot.slane %v982_v52, 7 }
0x14d6   :  { %v1531_v53 = vpop.eup %1530 }
0x14d7   :  { %985 = vrot.lane.b32.xlu1 %v1531_v53, %s1595_s11 }
0x1549   :  { %v986_v54 = vpop.permute.xlu1 %985 }
0x154a   :  { %v988_v55 = vmul.f32 %v1529_v47, %v986_v54 }
0x154c   :  { %v990_v56 = vrot.slane %v988_v55, 6  ;;  %v1107_v57 = vsel %vm1106_vm8, %v1105_v36, %v988_v55 }
0x154e   :  { %991 = vrot.lane.b32.xlu0 %v990_v56, %s1596_s3 }
0x15c0   :  { %v992_v58 = vpop.permute.xlu0 %991 }
0x15c1   :  { %1383 = vmatmul.mubr.msk.f32.vlgmr.msra.gmra.mrb[8].mxu1 %vm173_vm2, %v992_v58 }
0x1694   :  { %v1061_v59 = vpop.f32.mrb[8].mxu1 }
0x1695   :  { %v1066_v60 = vrot.slane %v1061_v59, 1  ;;  %v1384_v61 = vpop.f32.mrb[9].mxu1 }
0x1697   :  { %v1068_v62 = vadd.f32 %v1066_v60, %v1723_v37  ;;  %v1110_v37 = vld [vmem:[%s1833_s6] sm:$0xff] }
0x1698   :  { %v1454_v14 = vpack.c.bf16 %v1111_v12, %v1110_v37 }
0x1699   :  { %1532 = vtanh.f32 %v1068_v62  ;;  %v1223_v2 = vmul.f32 -1.442695, %v1068_v62 }
0x169a   :  { %1455 = vmatpush3.bf16.msra.mxu0 %v1454_v14 }
0x169b   :  { %1534 = vpow2.f32 %v1223_v2  ;;  %1456 = vmatprep.subr.bf16.mxu0 %v1592_v0 }
0x169e   :  { %1458 = vmatpush3.bf16.msra.mxu0 %v1457_v16 }
0x16a3   :  { %v1533_v63 = vpop.eup %1532 }
0x16a4   :  { %1081 = vrot.lane.b32.xlu1 %v1533_v63, %s1595_s11 }
0x16a5   :  { %v1535_v3 = vpop.eup %1534 }
0x16a6   :  { %v1072_v4 = vadd.f32 1.0, %v1535_v3 }
0x16a8   :  { %1536 = vrcp.f32 %v1072_v4 }
0x16b2   :  { %v1537_v5 = vpop.eup %1536 }
0x16b3   :  { %v1079_v9 = vmul.f32 %v1537_v5, %v1077_v8 }
0x1716   :  { %v1082_v6 = vpop.permute.xlu1 %1081 }
0x1717   :  { %v1084_v7 = vmul.f32 %v1537_v5, %v1082_v6 }
0x1719   :  { %1086 = vrot.lane.b32.xlu0 %v1084_v7, %s1595_s11 }
0x178b   :  { %v1087_v10 = vpop.permute.xlu0 %1086 }
0x178c   :  { %v1089_v11 = vadd.f32 %v1087_v10, %v1079_v9 }
0x178e   :  { %1538 = vtanh.f32 %v1089_v11 }
0x1798   :  { %v1539_v17 = vpop.eup %1538 }
0x1799   :  { %1092 = vrot.lane.b32.xlu1 %v1539_v17, %s1595_s11 }
0x180b   :  { %v1093_v18 = vpop.permute.xlu1 %1092 }
0x180c   :  { %v1095_v19 = vmul.f32 %v1537_v5, %v1093_v18 }
0x180e   :  { %v1109_v20 = vsel %vm1108_vm9, %v1107_v57, %v1095_v19 }
0x180f   :  { %1122 = vrot.lane.b32.xlu0 %v1109_v20, %s1596_s3 }
0x1881   :  { %v1123_v21 = vpop.permute.xlu0 %1122 }
0x1882   :  { %1394 = vmatmul.mubr.msk.f32.vlgmr.msra.gmra.mrb[10].mxu0 %vm173_vm2, %v1123_v21 }
0x1955   :  { %v1192_v23 = vpop.f32.mrb[10].mxu0 }
0x1956   :  { %v1193_v0 = vadd.f32 %v1224_v22, %v1192_v23  ;;  %v1395_v24 = vpop.f32.mrb[11].mxu0 }
0x1958   :  { %1197 = vst.msk [vmem:[%s1835_s8] sm:$0xff] %vm1196_vm10, %v1193_v0 }
0x1959   :  { %1202 = vsyncpa [#allocation3], 1 }
0x195a   :  { %1203 = vsyncpa [#allocation5], 1 }

</bundles_post_ra>
